<compile_context>
chip_gen: v5e
topology: v5e:2x2
jax: 0.10.0
libtpu: 0.0.40
codegen_flags: <defaults>
</compile_context>

<pallas_src>
import functools

import jax
import jax.numpy as jnp
from jax.experimental import pallas as pl
from jax.experimental.pallas import tpu as pltpu


def _round_up(n, m):
    return ((n + m - 1) // m) * m


# ---------------------------------------------------------------------------
# One-time weight prep (amortized to zero per forward call).
# Takes PyTorch nn.Linear layout: w1 [H, D_in], b1 [H], w2 [D_out, H], b2 [D_out].
# ---------------------------------------------------------------------------
def prepare_mlp_params(w1, b1, w2, b2):
    hidden, d_in = w1.shape
    d_out = w2.shape[0]
    d_out_p = _round_up(d_out, 128)

    # bf16 operands for the MXU, pre-transposed to [K, N] feed layout.
    w1t = jnp.asarray(w1, jnp.bfloat16).T                      # [D_in, H]
    w2t = jnp.asarray(w2, jnp.bfloat16).T                      # [H, D_out]
    b1_r = jnp.asarray(b1, jnp.float32).reshape(1, hidden)     # [1, H]
    b2_r = jnp.asarray(b2, jnp.float32).reshape(1, d_out)      # [1, D_out]

    # Lane-dense fc2 output: zero-pad output dim up to a multiple of 128.
    # Padded columns compute exactly ReLU(0 + 0) = 0 and are sliced off.
    if d_out_p != d_out:
        w2t = jnp.pad(w2t, ((0, 0), (0, d_out_p - d_out)))
        b2_r = jnp.pad(b2_r, ((0, 0), (0, d_out_p - d_out)))

    w1t, b1_r, w2t, b2_r = jax.device_put((w1t, b1_r, w2t, b2_r))
    return w1t, b1_r, w2t, b2_r, d_out


# ---------------------------------------------------------------------------
# Kernel: one batch tile -> fc1 + ReLU + fc2 + ReLU.
# ---------------------------------------------------------------------------
def mlp_kernel(x_ref, w1_ref, b1_ref, w2_ref, b2_ref, o_ref):
    # Cast x to bf16 in-kernel (VPU slot; saves a wrapper HBM pass).
    x_bf = x_ref[...].astype(jnp.bfloat16)
    # fc1: [TB, D_in] @ [D_in, H] -> [TB, H]  (bf16 operands, f32 accumulate)
    h = jnp.dot(x_bf, w1_ref[...], preferred_element_type=jnp.float32)
    h = jnp.maximum(h + b1_ref[...], 0.0)          # bias + ReLU in f32 (VPU)
    # fc2: [TB, H] @ [H, D_out_p] -> [TB, D_out_p]
    y = jnp.dot(h.astype(jnp.bfloat16), w2_ref[...],
                preferred_element_type=jnp.float32)
    y = jnp.maximum(y + b2_ref[...], 0.0)
    o_ref[...] = y.astype(o_ref.dtype)


# ---------------------------------------------------------------------------
# Forward wrapper (per-call): no weight work, no x cast, no batch pad.
# ---------------------------------------------------------------------------
@functools.partial(jax.jit, static_argnames=("d_out", "block_b"))
def mlp_forward(x, w1t, b1_r, w2t, b2_r, *, d_out, block_b=512):
    B = x.shape[0]
    x2d = x.reshape(B, -1).astype(jnp.float32)     # flatten (view-like reshape)
    d_in, hidden = w1t.shape
    d_out_p = w2t.shape[1]

    # Batch tiling: single full block for small B; for large B use block_b
    # (multiple of 128) and let Pallas mask the partial last block.
    if B <= block_b:
        tb = B
    else:
        tb = block_b
    n_b = pl.cdiv(B, tb)

    # VMEM budget: double-buffered x/out tiles + resident weights + slack.
    tile_bytes = 2 * (tb * d_in * 4 + tb * d_out_p * 4)
    weight_bytes = (d_in * hidden + hidden * d_out_p) * 2 + (hidden + d_out_p) * 4
    vmem_limit = min(max(tile_bytes + weight_bytes + (4 << 20), 16 << 20), 64 << 20)

    out = pl.pallas_call(
        mlp_kernel,
        out_shape=jax.ShapeDtypeStruct((B, d_out_p), jnp.float32),
        grid_spec=pl.GridSpec(
            grid=(n_b,),
            in_specs=[
                pl.BlockSpec((tb, d_in), lambda i: (i, 0)),          # x tiles pipeline
                pl.BlockSpec((d_in, hidden), lambda i: (0, 0)),      # w1 resident
                pl.BlockSpec((1, hidden), lambda i: (0, 0)),         # b1 resident
                pl.BlockSpec((hidden, d_out_p), lambda i: (0, 0)),   # w2 resident
                pl.BlockSpec((1, d_out_p), lambda i: (0, 0)),        # b2 resident
            ],
            out_specs=pl.BlockSpec((tb, d_out_p), lambda i: (i, 0)),
        ),
        compiler_params=pltpu.CompilerParams(
            # Batch axis is independent -> megacore / v7x's 2 TCs can split it
            # whenever n_b >= 2.
            dimension_semantics=("parallel",),
            vmem_limit_bytes=vmem_limit,
        ),
    )(x2d, w1t, b1_r, w2t, b2_r)
    return out[:, :d_out]


def reference_forward(x, w1, b1, w2, b2):
    B = x.shape[0]
    x2d = x.reshape(B, -1).astype(jnp.float32)
    h = jnp.maximum(x2d @ jnp.asarray(w1, jnp.float32).T + b1, 0.0)
    y = jnp.maximum(h @ jnp.asarray(w2, jnp.float32).T + b2, 0.0)
    return y


if __name__ == "__main__":
    # MNIST-like config: batch=2, input image [1, 28, 28] -> input_dim=784,
    # hidden_dim=128, output_dim=10 (module defaults).
    input_dim, hidden_dim, output_dim = 784, 128, 10
    batch = 2

    key = jax.random.PRNGKey(0)
    kx, k1, k2, k3, k4 = jax.random.split(key, 5)

    x = jax.random.normal(kx, (batch, 1, 28, 28), dtype=jnp.float32)

    # Deterministic synthetic parameters (PyTorch nn.Linear shapes).
    w1 = jax.random.normal(k1, (hidden_dim, input_dim), dtype=jnp.float32) * 0.05
    b1 = jax.random.normal(k2, (hidden_dim,), dtype=jnp.float32) * 0.05
    w2 = jax.random.normal(k3, (output_dim, hidden_dim), dtype=jnp.float32) * 0.05
    b2 = jax.random.normal(k4, (output_dim,), dtype=jnp.float32) * 0.05

    # One-time weight prep (outside the per-call path).
    w1t, b1_r, w2t, b2_r, d_out = prepare_mlp_params(w1, b1, w2, b2)

    out = mlp_forward(x, w1t, b1_r, w2t, b2_r, d_out=d_out)
    out = jax.block_until_ready(out)

    ref = reference_forward(x, w1, b1, w2, b2)
    assert out.shape == (batch, output_dim)
    # Tolerance loosened vs. the f32 reference because matmul operands are
    # quantized to bf16 (accumulation is still f32).
    assert jnp.allclose(out, ref, atol=2e-2, rtol=2e-2), "mismatch vs. reference"

    print("KERNEL_OK")
</pallas_src>

<mosaic_0001>
module attributes {stable_mosaic.version = 11 : i64} {
  func.func @mlp_kernel(%arg0: i32, %arg1: memref<2x784xf32, #tpu.memory_space<vmem>>, %arg2: memref<784x128xbf16, #tpu.memory_space<vmem>>, %arg3: memref<1x128xf32, #tpu.memory_space<vmem>>, %arg4: memref<128x128xbf16, #tpu.memory_space<vmem>>, %arg5: memref<1x128xf32, #tpu.memory_space<vmem>>, %arg6: memref<2x128xf32, #tpu.memory_space<vmem>>) attributes {dimension_semantics = [#tpu.dimension_semantics<parallel>], iteration_bounds = array<i64: 1>, scalar_prefetch = 0 : i64, scratch_operands = 0 : i64, tpu.core_type = #tpu.core_type<tc>, window_params = [{transform_indices = @transform_0, window_bounds = array<i64: 2, 784>}, {pipeline_mode = #tpu.pipeline_mode<synchronous>, transform_indices = @transform_1, window_bounds = array<i64: 784, 128>}, {pipeline_mode = #tpu.pipeline_mode<synchronous>, transform_indices = @transform_2, window_bounds = array<i64: 1, 128>}, {pipeline_mode = #tpu.pipeline_mode<synchronous>, transform_indices = @transform_3, window_bounds = array<i64: 128, 128>}, {pipeline_mode = #tpu.pipeline_mode<synchronous>, transform_indices = @transform_4, window_bounds = array<i64: 1, 128>}, {transform_indices = @transform_5, window_bounds = array<i64: 2, 128>}]} {
    %c0 = arith.constant 0 : index
    %c0_0 = arith.constant 0 : index
    %0 = vector.load %arg1[%c0, %c0_0] : memref<2x784xf32, #tpu.memory_space<vmem>>, vector<2x784xf32>
    %1 = arith.truncf %0 : vector<2x784xf32> to vector<2x784xbf16>
    %c0_1 = arith.constant 0 : index
    %c0_2 = arith.constant 0 : index
    %2 = vector.load %arg2[%c0_1, %c0_2] : memref<784x128xbf16, #tpu.memory_space<vmem>>, vector<784x128xbf16>
    %cst = arith.constant dense<0.000000e+00> : vector<2x128xf32>
    %3 = tpu.matmul %1, %2, %cst {dimension_numbers = #tpu.dot_dimension_numbers<[1], [0], [0], [1], [0, 0, 1, 1], [], []>} : vector<2x784xbf16>, vector<784x128xbf16>, vector<2x128xf32> -> vector<2x128xf32>
    %c0_3 = arith.constant 0 : index
    %c0_4 = arith.constant 0 : index
    %4 = vector.load %arg3[%c0_3, %c0_4] : memref<1x128xf32, #tpu.memory_space<vmem>>, vector<1x128xf32>
    %5 = vector.broadcast %4 : vector<1x128xf32> to vector<2x128xf32>
    %6 = arith.addf %3, %5 : vector<2x128xf32>
    %cst_5 = arith.constant 0.000000e+00 : f32
    %7 = vector.broadcast %cst_5 : f32 to vector<2x128xf32>
    %8 = arith.maximumf %6, %7 : vector<2x128xf32>
    %9 = arith.truncf %8 : vector<2x128xf32> to vector<2x128xbf16>
    %c0_6 = arith.constant 0 : index
    %c0_7 = arith.constant 0 : index
    %10 = vector.load %arg4[%c0_6, %c0_7] : memref<128x128xbf16, #tpu.memory_space<vmem>>, vector<128x128xbf16>
    %cst_8 = arith.constant dense<0.000000e+00> : vector<2x128xf32>
    %11 = tpu.matmul %9, %10, %cst_8 {dimension_numbers = #tpu.dot_dimension_numbers<[1], [0], [0], [1], [0, 0, 1, 1], [], []>} : vector<2x128xbf16>, vector<128x128xbf16>, vector<2x128xf32> -> vector<2x128xf32>
    %c0_9 = arith.constant 0 : index
    %c0_10 = arith.constant 0 : index
    %12 = vector.load %arg5[%c0_9, %c0_10] : memref<1x128xf32, #tpu.memory_space<vmem>>, vector<1x128xf32>
    %13 = vector.broadcast %12 : vector<1x128xf32> to vector<2x128xf32>
    %14 = arith.addf %11, %13 : vector<2x128xf32>
    %cst_11 = arith.constant 0.000000e+00 : f32
    %15 = vector.broadcast %cst_11 : f32 to vector<2x128xf32>
    %16 = arith.maximumf %14, %15 : vector<2x128xf32>
    %c0_12 = arith.constant 0 : index
    %c0_13 = arith.constant 0 : index
    %17 = vector.load %arg6[%c0_12, %c0_13] : memref<2x128xf32, #tpu.memory_space<vmem>>, vector<2x128xf32>
    tpu.vector_store %arg6[%c0_12, %c0_13], %16 {strides = array<i32>} : memref<2x128xf32, #tpu.memory_space<vmem>>, vector<2x128xf32>,
    return
  }
  func.func @transform_0(%arg0: i32) -> (i32, i32) {
    %c0_i32 = arith.constant 0 : i32
    %c0_i32_0 = arith.constant 0 : i32
    return %arg0, %c0_i32 : i32, i32
  }
  func.func @transform_1(%arg0: i32) -> (i32, i32) {
    %c0_i32 = arith.constant 0 : i32
    %c0_i32_0 = arith.constant 0 : i32
    %c0_i32_1 = arith.constant 0 : i32
    return %c0_i32, %c0_i32_0 : i32, i32
  }
  func.func @transform_2(%arg0: i32) -> (i32, i32) {
    %c0_i32 = arith.constant 0 : i32
    %c0_i32_0 = arith.constant 0 : i32
    %c0_i32_1 = arith.constant 0 : i32
    return %c0_i32, %c0_i32_0 : i32, i32
  }
  func.func @transform_3(%arg0: i32) -> (i32, i32) {
    %c0_i32 = arith.constant 0 : i32
    %c0_i32_0 = arith.constant 0 : i32
    %c0_i32_1 = arith.constant 0 : i32
    return %c0_i32, %c0_i32_0 : i32, i32
  }
  func.func @transform_4(%arg0: i32) -> (i32, i32) {
    %c0_i32 = arith.constant 0 : i32
    %c0_i32_0 = arith.constant 0 : i32
    %c0_i32_1 = arith.constant 0 : i32
    return %c0_i32, %c0_i32_0 : i32, i32
  }
  func.func @transform_5(%arg0: i32) -> (i32, i32) {
    %c0_i32 = arith.constant 0 : i32
    %c0_i32_0 = arith.constant 0 : i32
    return %arg0, %c0_i32 : i32, i32
  }
}

</mosaic_0001>

<bundles_post_ra>
// kernel: mlp_forward.1
= control target key start
LH: loop header
LB: loop body
LE: loop exit
PB: predicated region body
PF: predicated region fallthrough
CT: control target
= control target key end

     0   :  { %10 = vsyncpa [#allocation3], 0  ;;  %s1079_s0 = inlined_call_operand.vmem [shape: f32[2,784], index: 0, kind: input, shape index: {}]   ;;  %s1080_s1 = inlined_call_operand.hbm [shape: bf16[784,128], index: 1, kind: input, shape index: {}]   ;;  %s1081_s2 = inlined_call_operand.vmem [shape: f32[1,128], index: 2, kind: input, shape index: {}]   ;;  %s1082_s3 = inlined_call_operand.vmem [shape: bf16[128,128], index: 3, kind: input, shape index: {}]   ;;  %s1083_s4 = inlined_call_operand.vmem [shape: f32[1,128], index: 4, kind: input, shape index: {}]   ;;  %s1084_s5 = inlined_call_operand.hbm [shape: f32[2,128], index: 5, kind: output, shape index: {}]  }
   0x1   :  { %11 = vsyncpa [#allocation4], 0  ;;  %s18_s20 = sshll.u32 %s1080_s1, 4  ;;  %s1003_s21 = smov [#allocation2]   ;;  %s19_s20 = int_to_ptr.hbm [resolvable:$true] %s18_s20 }
   0x2   :  { %s20_s22 = sshll.u32 %s1003_s21, 4  ;;  %s1004_s23 = smov 64   ;;  %s21_s22 = int_to_ptr.vmem [resolvable:$true] %s20_s22 }
   0x3   :  { %s1005_s24 = smov 4  }
   0x4   :  { %26 = dma.hbm_to_vmem [thread:$0]  %s19_s20, 6272, %s21_s22, [#allocation3], %s1004_s23, %s1004_s23, %s1005_s24  }
   0x5   :  { %999 = dma.done.wait [#allocation3], 6272  }
   0x6   :  { %1000 = vsyncadd [#allocation3], 4294961024  ;;  %v895_v0 = vld [vmem:[#allocation2 + $0x38] sm:$0xff]  ;;  %v894_v3 = vld [vmem:[#allocation2 + $0x30] sm:$0xff]  ;;  %vm462_vm0 = vcmask 130048   ;;  %s1006_s20 = smov [#allocation5]  }
   0x7   :  { %v903_v1 = vld [vmem:[#allocation2 + $0x78] sm:$0xff]  ;;  %466 = vmatpush.bf16.msra.mxu0 %v895_v0  ;;  %v902_v4 = vld [vmem:[#allocation2 + $0x70] sm:$0xff]  ;;  %v893_v8 = vld [vmem:[#allocation2 + $0x28] sm:$0xff]  ;;  %s647_s21 = sshll.u32 %s1006_s20, 4  ;;  %s649_s24 = sshll.u32 %s1084_s5, 4  ;;  %s648_s21 = int_to_ptr.vmem [resolvable:$true] %s647_s21  ;;  %s650_s24 = int_to_ptr.hbm [resolvable:$true] %s649_s24 }
   0x8   :  { %v911_v2 = vld [vmem:[#allocation2 + $0xb8] sm:$0xff]  ;;  %479 = vmatpush.bf16.msra.mxu1 %v903_v1  ;;  %v910_v5 = vld [vmem:[#allocation2 + $0xb0] sm:$0xff]  ;;  %v901_v9 = vld [vmem:[#allocation2 + $0x68] sm:$0xff] }
   0x9   :  { %492 = vmatpush.bf16.msra.mxu2 %v911_v2  ;;  %v919_v6 = vld [vmem:[#allocation2 + $0xf8] sm:$0xff]  ;;  %v918_v7 = vld [vmem:[#allocation2 + $0xf0] sm:$0xff]  ;;  %v909_v10 = vld [vmem:[#allocation2 + $0xa8] sm:$0xff] }
   0xa   :  { %505 = vmatpush.bf16.msra.mxu3 %v919_v6  ;;  %v917_v11 = vld [vmem:[#allocation2 + $0xe8] sm:$0xff]  ;;  %v892_v12 = vld [vmem:[#allocation2 + $0x20] sm:$0xff]  ;;  %v38_v15 = vld [vmem:[%s1079_s0] sm:$0xff] }
   0xb   :  { %467 = vmatpush.bf16.msra.mxu0 %v894_v3  ;;  %v900_v13 = vld [vmem:[#allocation2 + $0x60] sm:$0xff]  ;;  %42 = vst [vmem:[#allocation1] ss:$4 sm:$0xff] %v38_v15  ;;  %v891_v17 = vld [vmem:[#allocation2 + $0x18] sm:$0xff]  ;;  %v890_v22 = vld [vmem:[#allocation2 + $0x10] sm:$0xff] }
   0xc   :  { %480 = vmatpush.bf16.msra.mxu1 %v902_v4  ;;  %v908_v14 = vld [vmem:[#allocation2 + $0xa0] sm:$0xff]  ;;  %v899_v18 = vld [vmem:[#allocation2 + $0x58] sm:$0xff]  ;;  %v898_v23 = vld [vmem:[#allocation2 + $0x50] sm:$0xff] }
   0xd   :  { %493 = vmatpush.bf16.msra.mxu2 %v910_v5  ;;  %v916_v16 = vld [vmem:[#allocation2 + $0xe0] sm:$0xff]  ;;  %v907_v20 = vld [vmem:[#allocation2 + $0x98] sm:$0xff]  ;;  %v906_v24 = vld [vmem:[#allocation2 + $0x90] sm:$0xff] }
   0xe   :  { %506 = vmatpush.bf16.msra.mxu3 %v918_v7  ;;  %v39_v19 = vld [vmem:[%s1079_s0 + $0x8] sm:$0x3f]  ;;  %v915_v21 = vld [vmem:[#allocation2 + $0xd8] sm:$0xff]  ;;  %v914_v25 = vld [vmem:[#allocation2 + $0xd0] sm:$0xff] }
   0xf   :  { %468 = vmatpush.bf16.msra.mxu0 %v893_v8  ;;  %44 = vst [vmem:[#allocation1 + $0x20] ss:$4 sm:$0xff] %v39_v19  ;;  %v889_v26 = vld [vmem:[#allocation2 + $0x8] sm:$0xff]  ;;  %v888_v29 = vld [vmem:[#allocation2] sm:$0xff]  ;;  %v927_v34 = vld [vmem:[#allocation2 + $0x138] sm:$0xff] }
  0x10   :  { %481 = vmatpush.bf16.msra.mxu1 %v901_v9  ;;  %v897_v27 = vld [vmem:[#allocation2 + $0x48] sm:$0xff]  ;;  %v896_v30 = vld [vmem:[#allocation2 + $0x40] sm:$0xff]  ;;  %v935_v35 = vld [vmem:[#allocation2 + $0x178] sm:$0xff] }
  0x11   :  { %494 = vmatpush.bf16.msra.mxu2 %v909_v10  ;;  %v905_v28 = vld [vmem:[#allocation2 + $0x88] sm:$0xff]  ;;  %v904_v36 = vld [vmem:[#allocation2 + $0x80] sm:$0xff]  ;;  %v926_v43 = vld [vmem:[#allocation2 + $0x130] sm:$0xff] }
  0x12   :  { %507 = vmatpush.bf16.msra.mxu3 %v917_v11  ;;  %v913_v31 = vld [vmem:[#allocation2 + $0xc8] sm:$0xff]  ;;  %v45_v32 = vld.sshfl [vmem:[#allocation1] sm:$0xff pattern:$0x73625140]  ;;  %v912_v40 = vld [vmem:[#allocation2 + $0xc0] sm:$0xff] }
  0x13   :  { %469 = vmatpush.bf16.msra.mxu0 %v892_v12  ;;  %v46_v33 = vld.sshfl [vmem:[#allocation1 + $0x8] sm:$0xff pattern:$0x73625140]  ;;  %v47_v37 = vld.sshfl [vmem:[#allocation1 + $0x10] sm:$0xff pattern:$0x73625140]  ;;  %v59_v38 = vpack.c.bf16 %v45_v32, %v45_v32 }
  0x14   :  { %482 = vmatpush.bf16.msra.mxu1 %v900_v13  ;;  %v60_v39 = vpack.c.bf16 %v46_v33, %v46_v33  ;;  %v936_v41 = vld [vmem:[#allocation2 + $0x180] sm:$0xff]  ;;  %v48_v42 = vld.sshfl [vmem:[#allocation1 + $0x18] sm:$0xff pattern:$0x73625140]  ;;  %v61_v45 = vpack.c.bf16 %v47_v37, %v47_v37  ;;  %v925_v47 = vld [vmem:[#allocation2 + $0x128] sm:$0xff] }
  0x15   :  { %495 = vmatpush.bf16.msra.mxu2 %v908_v14  ;;  %v934_v44 = vld [vmem:[#allocation2 + $0x170] sm:$0xff]  ;;  %v62_v46 = vpack.c.bf16 %v48_v42, %v48_v42  ;;  %v933_v48 = vld [vmem:[#allocation2 + $0x168] sm:$0xff]  ;;  %v924_v49 = vld [vmem:[#allocation2 + $0x120] sm:$0xff] }
  0x16   :  { %508 = vmatpush.bf16.msra.mxu3 %v916_v16  ;;  %v932_v50 = vld [vmem:[#allocation2 + $0x160] sm:$0xff]  ;;  %v923_v51 = vld [vmem:[#allocation2 + $0x118] sm:$0xff]  ;;  %v51_v53 = vld.sshfl [vmem:[#allocation1 + $0x30] sm:$0xff pattern:$0x73625140] }
  0x17   :  { %470 = vmatpush.bf16.msra.mxu0 %v891_v17  ;;  %v931_v52 = vld [vmem:[#allocation2 + $0x158] sm:$0xff]  ;;  %v922_v54 = vld [vmem:[#allocation2 + $0x110] sm:$0xff]  ;;  %v65_v56 = vpack.c.bf16 %v51_v53, %v51_v53  ;;  %v921_v57 = vld [vmem:[#allocation2 + $0x108] sm:$0xff] }
  0x18   :  { %483 = vmatpush.bf16.msra.mxu1 %v899_v18  ;;  %v930_v55 = vld [vmem:[#allocation2 + $0x150] sm:$0xff]  ;;  %v929_v58 = vld [vmem:[#allocation2 + $0x148] sm:$0xff]  ;;  %v920_v59 = vld [vmem:[#allocation2 + $0x100] sm:$0xff] }
  0x19   :  { %496 = vmatpush.bf16.msra.mxu2 %v907_v20  ;;  %v928_v60 = vld [vmem:[#allocation2 + $0x140] sm:$0xff]  ;;  %v49_v61 = vld.sshfl [vmem:[#allocation1 + $0x20] sm:$0xff pattern:$0x73625140]  ;;  %v944_v1 = vld [vmem:[%s1082_s3 + $0x38] sm:$0xff] }
  0x1a   :  { %509 = vmatpush.bf16.msra.mxu3 %v915_v21  ;;  %v50_v62 = vld.sshfl [vmem:[#allocation1 + $0x28] sm:$0xff pattern:$0x73625140]  ;;  %v63_v63 = vpack.c.bf16 %v49_v61, %v49_v61  ;;  %v943_v2 = vld [vmem:[%s1082_s3 + $0x30] sm:$0xff]  ;;  %v941_v4 = vld [vmem:[%s1082_s3 + $0x20] sm:$0xff] }
  0x1b   :  { %471 = vmatpush.bf16.msra.mxu0 %v890_v22  ;;  %v64_v0 = vpack.c.bf16 %v50_v62, %v50_v62  ;;  %v942_v3 = vld [vmem:[%s1082_s3 + $0x28] sm:$0xff]  ;;  %v940_v5 = vld [vmem:[%s1082_s3 + $0x18] sm:$0xff]  ;;  %v939_v6 = vld [vmem:[%s1082_s3 + $0x10] sm:$0xff] }
  0x1c   :  { %484 = vmatpush.bf16.msra.mxu1 %v898_v23  ;;  %v938_v7 = vld [vmem:[%s1082_s3 + $0x8] sm:$0xff]  ;;  %v937_v10 = vld [vmem:[%s1082_s3] sm:$0xff] }
  0x1d   :  { %497 = vmatpush.bf16.msra.mxu2 %v906_v24  ;;  %v949_v15 = vld [vmem:[%s1081_s2] ss:$0 sm:$0xff] }
  0x1e   :  { %510 = vmatpush.bf16.msra.mxu3 %v914_v25  ;;  %v950_v33 = vld [vmem:[%s1083_s4] ss:$0 sm:$0xff] }
  0x1f   :  { %472 = vmatpush.bf16.msra.mxu0 %v889_v26 }
  0x20   :  { %485 = vmatpush.bf16.msra.mxu1 %v897_v27 }
  0x21   :  { %498 = vmatpush.bf16.msra.mxu2 %v905_v28 }
  0x22   :  { %511 = vmatpush.bf16.msra.mxu3 %v913_v31 }
  0x23   :  { %473 = vmatpush.bf16.msra.mxu0 %v888_v29 }
  0x24   :  { %486 = vmatpush.bf16.msra.mxu1 %v896_v30 }
  0x25   :  { %499 = vmatpush.bf16.msra.mxu2 %v904_v36 }
  0x26   :  { %474 = vmatmul.bf16.vlgmr.msra.gmra.mxu0 %v59_v38  ;;  %512 = vmatpush.bf16.msra.mxu3 %v912_v40 }
  0x27   :  { %518 = vmatpush.bf16.msrb.mxu0 %v927_v34  ;;  %487 = vmatmul.bf16.vlgmr.msra.gmra.mxu1 %v60_v39 }
  0x28   :  { %531 = vmatpush.bf16.msrb.mxu1 %v935_v35  ;;  %500 = vmatmul.bf16.vlgmr.msra.gmra.mxu2 %v61_v45 }
  0x29   :  { %551 = vmatpush.bf16.msrb.mxu2 %v936_v41  ;;  %513 = vmatmul.bf16.vlgmr.msra.gmra.mxu3 %v62_v46 }
  0x2a   :  { %627 = vmatpush.bf16.msrb.mxu3 %v944_v1 }
  0x2b   :  { %519 = vmatpush.bf16.msrb.mxu0 %v926_v43 }
  0x2c   :  { %532 = vmatpush.bf16.msrb.mxu1 %v934_v44 }
  0x2e   :  { %628 = vmatpush.bf16.msrb.mxu3 %v943_v2 }
  0x2f   :  { %520 = vmatpush.bf16.msrb.mxu0 %v925_v47 }
  0x30   :  { %533 = vmatpush.bf16.msrb.mxu1 %v933_v48 }
  0x32   :  { %629 = vmatpush.bf16.msrb.mxu3 %v942_v3 }
  0x33   :  { %521 = vmatpush.bf16.msrb.mxu0 %v924_v49 }
  0x34   :  { %534 = vmatpush.bf16.msrb.mxu1 %v932_v50 }
  0x36   :  { %630 = vmatpush.bf16.msrb.mxu3 %v941_v4 }
  0x37   :  { %522 = vmatpush.bf16.msrb.mxu0 %v923_v51 }
  0x38   :  { %535 = vmatpush.bf16.msrb.mxu1 %v931_v52  ;;  %855 = vmatmul.msk.bf16.vlgmr.msrb.gmra.mxu2 %vm462_vm0, %v65_v56 }
  0x3a   :  { %631 = vmatpush.bf16.msrb.mxu3 %v940_v5 }
  0x3b   :  { %523 = vmatpush.bf16.msrb.mxu0 %v922_v54 }
  0x3c   :  { %536 = vmatpush.bf16.msrb.mxu1 %v930_v55 }
  0x3e   :  { %632 = vmatpush.bf16.msrb.mxu3 %v939_v6 }
  0x3f   :  { %524 = vmatpush.bf16.msrb.mxu0 %v921_v57 }
  0x40   :  { %537 = vmatpush.bf16.msrb.mxu1 %v929_v58 }
  0x42   :  { %633 = vmatpush.bf16.msrb.mxu3 %v938_v7 }
  0x43   :  { %525 = vmatpush.bf16.msrb.mxu0 %v920_v59 }
  0x44   :  { %538 = vmatpush.bf16.msrb.mxu1 %v928_v60 }
  0x46   :  { %526 = vmatmul.bf16.vlgmr.msrb.gmra.mxu0 %v63_v63  ;;  %634 = vmatpush.bf16.msrb.mxu3 %v937_v10 }
  0x47   :  { %539 = vmatmul.bf16.vlgmr.msrb.gmra.mxu1 %v64_v0 }
  0xa3   :  { %v475_v8 = vpop.f32.mrf.mxu0 }
  0xa4   :  { %v488_v9 = vpop.f32.mrf.mxu1  ;;  %v476_v16 = vadd.f32 %v949_v15, %v475_v8 }
  0xa6   :  { %v489_v19 = vadd.f32 %v488_v9, %v476_v16 }
  0xab   :  { %v477_v11 = vpop.f32.mrf.mxu0  ;;  %v501_v13 = vpop.f32.mrf.mxu2 }
  0xac   :  { %v490_v12 = vpop.f32.mrf.mxu1  ;;  %v514_v14 = vpop.f32.mrf.mxu3  ;;  %v502_v20 = vadd.f32 %v501_v13, %v489_v19 }
  0xae   :  { %v515_v22 = vadd.f32 %v514_v14, %v502_v20 }
  0xb3   :  { %v503_v17 = vpop.f32.mrf.mxu2 }
  0xb4   :  { %v516_v18 = vpop.f32.mrf.mxu3 }
  0xbb   :  { %v553_v21 = vpop.f32.mrf.mxu2 }
  0xc3   :  { %v527_v23 = vpop.f32.mrf.mxu0  ;;  %v555_v27 = vpop.f32.mrf.mxu2 }
  0xc4   :  { %v540_v24 = vpop.f32.mrf.mxu1  ;;  %v528_v25 = vadd.f32 %v527_v23, %v515_v22 }
  0xc6   :  { %v541_v26 = vadd.f32 %v540_v24, %v528_v25 }
  0xc8   :  { %v554_v28 = vadd.f32 %v553_v21, %v541_v26 }
  0xca   :  { %v557_v29 = vmax.f32 %v554_v28, 0.0 }
  0xcb   :  { %v529_v30 = vpop.f32.mrf.mxu0 }
  0xcc   :  { %v542_v31 = vpop.f32.mrf.mxu1  ;;  %v558_v32 = vpack.c.bf16 %v557_v29, %v557_v29 }
  0xce   :  { %635 = vmatmul.bf16.vlgmr.msrb.gmra.mxu3 %v558_v32 }
 0x151   :  { %v636_v34 = vpop.f32.mrf.mxu3 }
 0x152   :  { %v637_v35 = vadd.f32 %v950_v33, %v636_v34 }
 0x154   :  { %v640_v36 = vmax.f32 %v637_v35, 0.0 }
 0x156   :  { %641 = vst [vmem:[#allocation5] sm:$0x3] %v640_v36 }
 0x157   :  { %652 = dma.vmem_to_hbm [thread:$0]  %s648_s21, 32, %s650_s24, [#allocation4]  }
 0x159   :  { %v638_v37 = vpop.f32.mrf.mxu3 }
 0x15a   :  { %1001 = dma.done.wait [#allocation4], 32  }
 0x15b   :  { %1002 = vsyncadd [#allocation4], 4294967264 }
 0x15c   :  { %657 = vsyncpa [#allocation3], 1 }
 0x15d   :  { %658 = vsyncpa [#allocation4], 1 }

</bundles_post_ra>
